<compile_context>
chip_gen: v7x
topology: tpu7x:2x2x1
jax: 0.10.0
libtpu: 0.0.40
codegen_flags: <defaults>
</compile_context>

<pallas_src>
import functools

import jax
import jax.numpy as jnp
from jax.experimental import pallas as pl
from jax.experimental.pallas import tpu as pltpu


def _round_up(x, m):
    return (x + m - 1) // m * m


def _ln_channels_first(x_f32, lnw, lnb, eps):
    # x_f32: (1, C, ts); reduce over the channel (sublane) axis.
    mean = jnp.mean(x_f32, axis=1, keepdims=True)
    xc = x_f32 - mean
    var = jnp.mean(xc * xc, axis=1, keepdims=True)
    inv = jax.lax.rsqrt(var + eps)
    return xc * inv * lnw + lnb


def _mln_kernel(x_ref, lnw_ref, lnb_ref, o_ref, *, eps):
    x = x_ref[...].astype(jnp.float32)                       # (1, C, ts)
    y = _ln_channels_first(x, lnw_ref[...].astype(jnp.float32),
                           lnb_ref[...].astype(jnp.float32), eps)
    o_ref[...] = y.astype(o_ref.dtype)


def _mln_kernel_w(x_ref, w_ref, lnw_ref, lnb_ref, o_ref, *, eps):
    x = x_ref[...].astype(jnp.float32)                       # (1, C, ts)
    y = _ln_channels_first(x, lnw_ref[...].astype(jnp.float32),
                           lnb_ref[...].astype(jnp.float32), eps)
    w = w_ref[...].astype(jnp.float32)                       # (1, 1|C, ts)
    o_ref[...] = (w * y).astype(o_ref.dtype)


def modulated_layer_norm(x, params, w=None, *, eps=1e-6, channels_first=True,
                         max_block_bytes=1 << 20):
    """x: (B, C, T, H, W) if channels_first else (B, T, H, W, C)."""
    ln_weight, ln_bias, gamma, beta = (
        params["ln_weight"], params["ln_bias"], params["gamma"], params["beta"])

    if channels_first:
        B, C, T, H, W = x.shape
        S = T * H * W
        x3 = x.reshape(B, C, S)                 # contiguous view: free
    else:
        # TODO(synk): channels-last input still pays one transpose each way.
        B, T, H, W, C = x.shape
        S = T * H * W
        x3 = jnp.transpose(x.reshape(B, S, C), (0, 2, 1))

    # Fold scalar gamma/beta modulation into the LN affine parameters.
    lnw = ln_weight.astype(jnp.float32)
    lnb = ln_bias.astype(jnp.float32)
    if w is not None:
        g = jnp.asarray(gamma, jnp.float32).reshape(())
        b = jnp.asarray(beta, jnp.float32).reshape(())
        lnw = g * lnw
        lnb = g * lnb + b
    lnw3 = lnw.reshape(1, C, 1)
    lnb3 = lnb.reshape(1, C, 1)

    # Spatial (lane) tile: multiple of 128, roughly max_block_bytes per x block.
    itemsize = jnp.dtype(x.dtype).itemsize
    max_ts = max(128, (max_block_bytes // (C * itemsize)) // 128 * 128)
    ts = min(max_ts, _round_up(S, 128))
    S_pad = _round_up(S, ts)
    if S_pad != S:
        x3 = jnp.pad(x3, ((0, 0), (0, 0), (0, S_pad - S)))
    grid = (B, S_pad // ts)

    x_spec = pl.BlockSpec((1, C, ts), lambda bi, si: (bi, 0, si))
    p_spec = pl.BlockSpec((1, C, 1), lambda bi, si: (0, 0, 0))
    cparams = pltpu.CompilerParams(
        dimension_semantics=("parallel", "parallel"))
    out_shape = jax.ShapeDtypeStruct((B, C, S_pad), x.dtype)

    if w is None:
        out3 = pl.pallas_call(
            functools.partial(_mln_kernel, eps=eps),
            out_shape=out_shape,
            grid=grid,
            in_specs=[x_spec, p_spec, p_spec],
            out_specs=x_spec,
            compiler_params=cparams,
        )(x3, lnw3, lnb3)
    else:
        w = jnp.asarray(w)
        channel_dep = (w.ndim >= 1 and C != 1 and w.shape[-1] == C)
        if not channel_dep:
            # Common case: w has no channel axis -> one scalar per (b, spatial)
            # position.  Only a (B, S) array is materialized (C x smaller than x).
            w3 = jnp.broadcast_to(w, (B, T, H, W, 1)).reshape(B, 1, S)
            wC = 1
        else:
            # General fallback (w varies along C): materialize in channels-first
            # layout and stream it with the same blocking as x.
            w3 = jnp.transpose(
                jnp.broadcast_to(w, (B, T, H, W, C)).reshape(B, S, C), (0, 2, 1))
            wC = C
        w3 = w3.astype(x.dtype)
        if S_pad != S:
            w3 = jnp.pad(w3, ((0, 0), (0, 0), (0, S_pad - S)))
        w_spec = pl.BlockSpec((1, wC, ts), lambda bi, si: (bi, 0, si))
        out3 = pl.pallas_call(
            functools.partial(_mln_kernel_w, eps=eps),
            out_shape=out_shape,
            grid=grid,
            in_specs=[x_spec, w_spec, p_spec, p_spec],
            out_specs=x_spec,
            compiler_params=cparams,
        )(x3, w3, lnw3, lnb3)

    if S_pad != S:
        out3 = out3[:, :, :S]
    if channels_first:
        return out3.reshape(B, C, T, H, W)
    return jnp.transpose(out3, (0, 2, 1)).reshape(B, T, H, W, C)


def _reference(x, params, w=None, *, eps=1e-6):
    # Pure-JAX reference mirroring the PyTorch module (channels_first=True).
    x_cl = jnp.transpose(x, (0, 2, 3, 4, 1)).astype(jnp.float32)
    mean = jnp.mean(x_cl, axis=-1, keepdims=True)
    var = jnp.mean((x_cl - mean) ** 2, axis=-1, keepdims=True)
    y = (x_cl - mean) / jnp.sqrt(var + eps) * params["ln_weight"] + params["ln_bias"]
    if w is not None:
        w_cl = jnp.broadcast_to(w.astype(jnp.float32), x_cl.shape)
        y = params["gamma"].reshape(()) * w_cl * y + params["beta"].reshape(()) * w_cl
    return jnp.transpose(y, (0, 4, 1, 2, 3)).astype(x.dtype)


if __name__ == "__main__":
    key = jax.random.PRNGKey(0)
    k_x, k_w, k_wc, k_lnw, k_lnb, k_g, k_b = jax.random.split(key, 7)

    B, C, T, H, W = 2, 32, 4, 8, 8            # num_features = C = 32
    x = jax.random.normal(k_x, (B, C, T, H, W), dtype=jnp.float32)
    # modulation signal with no channel dependence (broadcast over C)
    w = jax.random.normal(k_w, (B, T, H, W, 1), dtype=jnp.float32)
    # channel-dependent modulation (exercises the general fallback path)
    w_c = jax.random.normal(k_wc, (C,), dtype=jnp.float32)

    params = {
        "ln_weight": jax.random.normal(k_lnw, (C,), dtype=jnp.float32),
        "ln_bias": jax.random.normal(k_lnb, (C,), dtype=jnp.float32),
        "gamma": jax.random.normal(k_g, (1, 1, 1), dtype=jnp.float32),
        "beta": jax.random.normal(k_b, (1, 1, 1), dtype=jnp.float32),
    }

    out_no_w = jax.block_until_ready(modulated_layer_norm(x, params, w=None))
    out_w = jax.block_until_ready(modulated_layer_norm(x, params, w=w))
    out_wc = jax.block_until_ready(modulated_layer_norm(x, params, w=w_c))

    ref_no_w = _reference(x, params, w=None)
    ref_w = _reference(x, params, w=w)
    ref_wc = _reference(x, params, w=w_c)

    assert out_no_w.shape == (B, C, T, H, W)
    assert out_w.shape == (B, C, T, H, W)
    assert jnp.allclose(out_no_w, ref_no_w, atol=1e-4, rtol=1e-4)
    assert jnp.allclose(out_w, ref_w, atol=1e-4, rtol=1e-4)
    assert jnp.allclose(out_wc, ref_wc, atol=1e-4, rtol=1e-4)

    print("KERNEL_OK")
</pallas_src>

<mosaic_0001>
module attributes {stable_mosaic.version = 11 : i64} {
  func.func @_mln_kernel(%arg0: i32, %arg1: i32, %arg2: memref<1x32x256xf32, #tpu.memory_space<vmem>>, %arg3: memref<1x32x1xf32, #tpu.memory_space<vmem>>, %arg4: memref<1x32x1xf32, #tpu.memory_space<vmem>>, %arg5: memref<1x32x256xf32, #tpu.memory_space<vmem>>) attributes {dimension_semantics = [#tpu.dimension_semantics<parallel>, #tpu.dimension_semantics<parallel>], iteration_bounds = array<i64: 2, 1>, scalar_prefetch = 0 : i64, scratch_operands = 0 : i64, tpu.core_type = #tpu.core_type<tc>, window_params = [{transform_indices = @transform_0, window_bounds = array<i64: 1, 32, 256>}, {pipeline_mode = #tpu.pipeline_mode<synchronous>, transform_indices = @transform_1, window_bounds = array<i64: 1, 32, 1>}, {pipeline_mode = #tpu.pipeline_mode<synchronous>, transform_indices = @transform_2, window_bounds = array<i64: 1, 32, 1>}, {transform_indices = @transform_3, window_bounds = array<i64: 1, 32, 256>}]} {
    %c0 = arith.constant 0 : index
    %c0_0 = arith.constant 0 : index
    %c0_1 = arith.constant 0 : index
    %0 = vector.load %arg2[%c0, %c0_0, %c0_1] : memref<1x32x256xf32, #tpu.memory_space<vmem>>, vector<1x32x256xf32>
    %c0_2 = arith.constant 0 : index
    %c0_3 = arith.constant 0 : index
    %c0_4 = arith.constant 0 : index
    %1 = vector.load %arg3[%c0_2, %c0_3, %c0_4] : memref<1x32x1xf32, #tpu.memory_space<vmem>>, vector<1x32x1xf32>
    %c0_5 = arith.constant 0 : index
    %c0_6 = arith.constant 0 : index
    %c0_7 = arith.constant 0 : index
    %2 = vector.load %arg4[%c0_5, %c0_6, %c0_7] : memref<1x32x1xf32, #tpu.memory_space<vmem>>, vector<1x32x1xf32>
    %cst = arith.constant dense<0.000000e+00> : vector<1x256xf32>
    %3 = vector.multi_reduction <add>, %0, %cst [1] : vector<1x32x256xf32> to vector<1x256xf32>
    %4 = vector.shape_cast %3 : vector<1x256xf32> to vector<1x1x256xf32>
    %cst_8 = arith.constant 3.200000e+01 : f32
    %5 = vector.broadcast %cst_8 : f32 to vector<1x1x256xf32>
    %6 = arith.divf %4, %5 : vector<1x1x256xf32>
    %7 = vector.broadcast %6 : vector<1x1x256xf32> to vector<1x32x256xf32>
    %8 = arith.subf %0, %7 : vector<1x32x256xf32>
    %9 = arith.mulf %8, %8 : vector<1x32x256xf32>
    %cst_9 = arith.constant dense<0.000000e+00> : vector<1x256xf32>
    %10 = vector.multi_reduction <add>, %9, %cst_9 [1] : vector<1x32x256xf32> to vector<1x256xf32>
    %11 = vector.shape_cast %10 : vector<1x256xf32> to vector<1x1x256xf32>
    %cst_10 = arith.constant 3.200000e+01 : f32
    %12 = vector.broadcast %cst_10 : f32 to vector<1x1x256xf32>
    %13 = arith.divf %11, %12 : vector<1x1x256xf32>
    %cst_11 = arith.constant 9.99999997E-7 : f32
    %14 = vector.broadcast %cst_11 : f32 to vector<1x1x256xf32>
    %15 = arith.addf %13, %14 : vector<1x1x256xf32>
    %16 = math.rsqrt %15 : vector<1x1x256xf32>
    %17 = vector.broadcast %16 : vector<1x1x256xf32> to vector<1x32x256xf32>
    %18 = arith.mulf %8, %17 : vector<1x32x256xf32>
    %19 = vector.broadcast %1 : vector<1x32x1xf32> to vector<1x32x256xf32>
    %20 = arith.mulf %18, %19 : vector<1x32x256xf32>
    %21 = vector.broadcast %2 : vector<1x32x1xf32> to vector<1x32x256xf32>
    %22 = arith.addf %20, %21 : vector<1x32x256xf32>
    %c0_12 = arith.constant 0 : index
    %c0_13 = arith.constant 0 : index
    %c0_14 = arith.constant 0 : index
    %23 = vector.load %arg5[%c0_12, %c0_13, %c0_14] : memref<1x32x256xf32, #tpu.memory_space<vmem>>, vector<1x32x256xf32>
    tpu.vector_store %arg5[%c0_12, %c0_13, %c0_14], %22 {strides = array<i32>} : memref<1x32x256xf32, #tpu.memory_space<vmem>>, vector<1x32x256xf32>,
    return
  }
  func.func @transform_0(%arg0: i32, %arg1: i32) -> (i32, i32, i32) {
    %c0_i32 = arith.constant 0 : i32
    %c0_i32_0 = arith.constant 0 : i32
    return %arg0, %c0_i32, %arg1 : i32, i32, i32
  }
  func.func @transform_1(%arg0: i32, %arg1: i32) -> (i32, i32, i32) {
    %c0_i32 = arith.constant 0 : i32
    %c0_i32_0 = arith.constant 0 : i32
    %c0_i32_1 = arith.constant 0 : i32
    %c0_i32_2 = arith.constant 0 : i32
    return %c0_i32, %c0_i32_0, %c0_i32_1 : i32, i32, i32
  }
  func.func @transform_2(%arg0: i32, %arg1: i32) -> (i32, i32, i32) {
    %c0_i32 = arith.constant 0 : i32
    %c0_i32_0 = arith.constant 0 : i32
    %c0_i32_1 = arith.constant 0 : i32
    %c0_i32_2 = arith.constant 0 : i32
    return %c0_i32, %c0_i32_0, %c0_i32_1 : i32, i32, i32
  }
  func.func @transform_3(%arg0: i32, %arg1: i32) -> (i32, i32, i32) {
    %c0_i32 = arith.constant 0 : i32
    %c0_i32_0 = arith.constant 0 : i32
    return %arg0, %c0_i32, %arg1 : i32, i32, i32
  }
}

</mosaic_0001>

<bundles_post_ra>
// kernel: tpu_custom_call.1
= control target key start
LH: loop header
LB: loop body
LE: loop exit
PB: predicated region body
PF: predicated region fallthrough
CT: control target
= control target key end

     0   :  { %8 = vsyncpa [#allocation3], 0  ;;  %s905_s0 = inlined_call_operand.hbm [shape: f32[2,32,256], index: 0, kind: input, shape index: {}]   ;;  %s906_s1 = inlined_call_operand.vmem [shape: f32[1,32,1], index: 1, kind: input, shape index: {}]   ;;  %s907_s2 = inlined_call_operand.vmem [shape: f32[1,32,1], index: 2, kind: input, shape index: {}]   ;;  %s908_s3 = inlined_call_operand.hbm [shape: f32[2,32,256], index: 3, kind: output, shape index: {}]  }
   0x1   :  { %10 = vsyncpa [#allocation3 + $0x1], 0 }
   0x2   :  { %11 = vsyncpa [#allocation4], 0 }
   0x3   :  { %13 = vsyncpa [#allocation4 + $0x1], 0  ;;  %s692_s12 = smov 0   ;;  %s694_s13 = smov 0  }
   0x4   :  { %s696_s14 = smov 0   ;;  %s698_s15 = smov 0  }
   0x5   :  { %s700_s16 = smov 0   ;;  %s702_s17 = smov 0  }
   0x6 LB: > { %s461_s18 = sadd.s32 4294967295, %s663_s17   ;;  %s462_s19 = sadd.s32 4294967294, %s663_s17   ;;  %s663_s17 = sphi %s702_s17, %s19_s17   ;;  %s659_s16 = sphi %s700_s16, %s923_s16   ;;  %s655_s15 = sphi %s698_s15, %s922_s15   ;;  %s651_s14 = sphi %s696_s14, %s921_s14   ;;  %s647_s13 = sphi %s694_s13, %s920_s13   ;;  %s643_s12 = sphi %s692_s12, %s919_s12  }
   0x7   : > { %s31_s20 = sadd.s32 1, %s659_s16  ;;  %s40_s21 = sadd.s32 1, %s651_s14 }
   0x8   : > { %p33_p0 = scmp.ge.s32.totalorder %s31_s20, 2  ;;  %p47_p1 = scmp.ne.s32.totalorder %s651_s14, %s647_s13 }
   0x9   : > { %p48_p2 = scmp.eq.s32.totalorder %s663_s17, 0  ;;  %p53_p3 = scmp.ne.s32.totalorder %s647_s13, %s643_s12 }
   0xa   : > { %s925_s20 = smov (%p33_p0, %s31_s20), 0  ;;  %p54_p5 = scmp.eq.s32.totalorder %s461_s18, 0 }
   0xb   : > { %p733_p4 = por %p48_p2, %p47_p1  ;;  %s35_s23 = ssub.s32 %s659_s16, %s925_s20 }
   0xc   : > { %p121_p6 = scmp.eq.s32.totalorder %s461_s18, 1  ;;  %p38_p7 = scmp.eq.s32.totalorder %s35_s23, 0 }
   0xd   : > { %p739_p8 = por %p54_p5, %p53_p3  ;;  %p127_p10 = scmp.eq.s32.totalorder %s462_s19, 1 }
   0xe   : > { %p743_p9 = por %p121_p6, %p47_p1  ;;  %p490_p13 = scmp.lt.s32.totalorder %s663_s17, 2 }
   0xf   : > { %s748_s26 = scalar_select %p38_p7, %s651_s14, %s40_s21  }
  0x10   : > { %s912_s25 = scalar_select %p743_p9, 1, 0 }
  0x11   : > { %p750_p11 = por %p127_p10, %p53_p3  ;;  %s153_s28 = sand.u32 1, %s651_s14  }
  0x12   : > { %s465_s29 = sshll.u32 %s153_s28, 6  ;;  %s476_s30 = sshll.u32 %s659_s16, 10 }
  0x13   : > { %s913_s27 = scalar_select %p750_p11, 1, 0 }
  0x14   : > { %s761_s6 = scalar_lea.hbm %s905_s0, %s476_s30  ;;  %s157_s7 = scalar_lea.vmem [#allocation2], %s465_s29 }
  0x15   : > { %s166_s8 = sshll.u32 %s157_s7, 4  ;;  %p767_p0 = pnand %p490_p13, %p733_p4  ;;  %s763_s8 = int_to_ptr.vmem [resolvable:$true] %s166_s8 }
  0x16   : > { %s772_s10 = scalar_lea.sflag [#allocation3], %s153_s28  ;;  %s551_s11 = scalar_lea.hbm %s761_s6, 1024 }
  0x17   : > { %p552_p2 = scmp.ne.s32.totalorder %s761_s6, %s551_s11  ;;  %p553_p3 = pneg %p767_p0 }
  0x18   : > { %s556_s21 = scalar_lea.hbm %s905_s0, 2048  ;;  %p557_p4 = scmp.lt.u32.totalorder %s761_s6, %s905_s0 }
  0x19   : > { %p554_p5 = pnand %p553_p3, %p552_p2  ;;  %p558_p7 = scmp.lt.u32.totalorder %s556_s21, %s551_s11 }
  0x1a   : > { %p560_p13 = scmp.lt.u32.totalorder %s551_s11, %s761_s6 }
  0x1b   : > { %p555_p6 = pneg %p554_p5  ;;  %p559_p10 = por %p558_p7, %p557_p4 }
  0x1d   : > { %p561_p12 = por %p560_p13, %p559_p10 }
  0x1f   : > { %p562_p1 = pnand %p561_p12, %p555_p6 }
  0x21   : > { %565 = shalt.err (!%p562_p1)
}
  0x22   : > { %s566_s28 = scalar_lea.vmem %s763_s8, 1024  ;;  %s665_s29 = smov [#allocation2]  }
  0x23   : > { %p567_p2 = scmp.ne.s32.totalorder %s763_s8, %s566_s28  ;;  %s571_s30 = sshll.u32 %s665_s29, 4  ;;  %s572_s30 = int_to_ptr.vmem [resolvable:$false] %s571_s30 }
  0x24   : > { %s573_s4 = scalar_lea.vmem %s572_s30, 2048  ;;  %p574_p9 = scmp.lt.s32.totalorder %s763_s8, %s572_s30 }
  0x25   : > { %p569_p5 = pnand %p567_p2, %p553_p3  ;;  %p575_p4 = scmp.lt.s32.totalorder %s573_s4, %s566_s28 }
  0x27   : > { %p570_p11 = pneg %p569_p5  ;;  %p576_p7 = por %p575_p4, %p574_p9 }
  0x29   : > { %p577_p10 = pnand %p576_p7, %p570_p11 }
  0x2b   : > { %580 = shalt.err (!%p577_p10)
}
  0x2c   : > { %s666_s5 = smov 256   ;;  %s667_s7 = smov 16  }
  0x2d   : > { %485 = dma.hbm_to_vmem [thread:$0]  (!%p767_p0), %s761_s6, 1024, %s763_s8, %s772_s10, %s666_s5, %s666_s5, %s667_s7  }
  0x2e   : > { %p174_p12 = scmp.lt.s32.totalorder %s663_s17, 3  ;;  %p915_p1 = scmp.ge.s32.totalorder %s663_s17, 1 }
  0x30   : > { %p175_p3 = pnand %p915_p1, %p174_p12 }
  0x31   : > { %s804_s11 = sand.u32 (!%p175_p3), 1, %s647_s13  }
  0x32   : > { %178 = sbr.rel (%p175_p3) target bundleno = 218 (0xda), region = 32  ;;  %s469_s18 = sshll.u32 (!%p175_p3), %s804_s11, 6 }
  0x33   : > { %s181_s19 = scalar_lea.sflag (!%p175_p3), [#allocation3], %s804_s11  ;;  %s810_s21 = scalar_lea.vmem (!%p175_p3), [#allocation2], %s469_s18 }
  0x39   : > { %634 = dma.done.wait (%p739_p8), %s181_s19, 1024  }
  0x3a   : > { %636 = vsyncadd (%p739_p8), %s181_s19, 4294966272  ;;  %v668_v0 = vmov 0   ;;  %v219_v1 = vld [vmem:[%s906_s1 + $0x10] sm:$0xff]  ;;  %v217_v2 = vld [vmem:[%s906_s1] sm:$0xff]  ;;  %s477_s10 = sshll.u32 %s655_s15, 10  ;;  %s359_s23 = scalar_lea.sflag [#allocation4], %s804_s11 }
  0x3b   : > { %546 = vset.pattern.permute.xlu1 %v668_v0  ;;  %545 = vset.pattern.permute.xlu0 %v668_v0  ;;  %v220_v3 = vld [vmem:[%s906_s1 + $0x18] sm:$0xff]  ;;  %v218_v4 = vld [vmem:[%s906_s1 + $0x8] sm:$0xff]  ;;  %v221_v6 = vld [vmem:[%s907_s2] sm:$0xff]  ;;  %s856_s15 = scalar_lea.hbm %s908_s3, %s477_s10  ;;  %p916_p9 = scmp.ne.s32.totalorder %s912_s25, 0 }
  0x3c   : > { %306 = vperm.xlu1 %546, %v219_v1   ;;  %296 = vperm.xlu0 %545, %v217_v2   ;;  %v222_v5 = vld [vmem:[%s907_s2 + $0x8] sm:$0xff]  ;;  %v224_v7 = vld [vmem:[%s907_s2 + $0x18] sm:$0xff]  ;;  %v223_v8 = vld [vmem:[%s907_s2 + $0x10] sm:$0xff]  ;;  %s669_s28 = smov [#allocation5]  }
  0x3d   : > { %v209_v9 = vld [vmem:[%s810_s21] sm:$0xff]  ;;  %v211_v10 = vld [vmem:[%s810_s21 + $0x10] sm:$0xff]  ;;  %v210_v11 = vld [vmem:[%s810_s21 + $0x8] sm:$0xff]  ;;  %s585_s29 = sshll.u32 %s669_s28, 4  ;;  %s586_s29 = int_to_ptr.vmem [resolvable:$false] %s585_s29 }
  0x3e   : > { %v212_v12 = vld [vmem:[%s810_s21 + $0x18] sm:$0xff]  ;;  %v225_v13 = vadd.f32 %v211_v10, %v209_v9  ;;  %v213_v14 = vld [vmem:[%s810_s21 + $0x20] sm:$0xff]  ;;  %v214_v16 = vld [vmem:[%s810_s21 + $0x28] sm:$0xff]  ;;  %s587_s30 = scalar_lea.vmem %s586_s29, 2048 }
  0x3f   : > { %v234_v15 = vadd.f32 %v212_v12, %v210_v11  ;;  %v215_v18 = vld [vmem:[%s810_s21 + $0x30] sm:$0xff]  ;;  %v216_v20 = vld [vmem:[%s810_s21 + $0x38] sm:$0xff]  ;;  %s206_s21 = scalar_lea.vmem [#allocation5], %s469_s18 }
  0x40   : > { %311 = vperm.xlu1 %546, %v220_v3   ;;  %301 = vperm.xlu0 %545, %v218_v4   ;;  %v226_v17 = vadd.f32 %v225_v13, %v213_v14  ;;  %s374_s9 = sshll.u32 %s206_s21, 4  ;;  %s851_s9 = int_to_ptr.vmem [resolvable:$true] %s374_s9 }
  0x41   : > { %v235_v19 = vadd.f32 %v234_v15, %v214_v16  ;;  %s581_s24 = scalar_lea.vmem %s851_s9, 1024  ;;  %p588_p6 = scmp.lt.s32.totalorder %s851_s9, %s586_s29 }
  0x42   : > { %v227_v21 = vadd.f32 %v226_v17, %v215_v18  ;;  %p582_p8 = scmp.ne.s32.totalorder %s851_s9, %s581_s24  ;;  %p589_p13 = scmp.lt.s32.totalorder %s587_s30, %s581_s24 }
  0x43   : > { %v236_v22 = vadd.f32 %v235_v19, %v216_v20 }
  0x44   : > { %329 = vperm.xlu1 %546, %v222_v5   ;;  %324 = vperm.xlu0 %545, %v221_v6   ;;  %v228_v23 = vrot.slane %v227_v21, 4  ;;  %p583_p11 = pnand %p582_p8, %p916_p9  ;;  %p590_p2 = por %p589_p13, %p588_p6 }
  0x45   : > { %v237_v24 = vrot.slane %v236_v22, 4 }
  0x46   : > { %v229_v25 = vadd.f32 %v228_v23, %v227_v21  ;;  %p584_p0 = pneg %p583_p11 }
  0x47   : > { %v238_v26 = vadd.f32 %v237_v24, %v236_v22 }
  0x48   : > { %339 = vperm.xlu1 %546, %v224_v7   ;;  %334 = vperm.xlu0 %545, %v223_v8   ;;  %v230_v27 = vrot.slane %v229_v25, 2  ;;  %p591_p5 = pnand %p590_p2, %p584_p0 }
  0x49   : > { %v239_v28 = vrot.slane %v238_v26, 2 }
  0x4a   : > { %v231_v29 = vadd.f32 %v230_v27, %v229_v25 }
  0x4b   : > { %v240_v30 = vadd.f32 %v239_v28, %v238_v26 }
  0x4c   : > { %v232_v31 = vrot.slane %v231_v29, 1 }
  0x4d   : > { %v241_v32 = vrot.slane %v240_v30, 1 }
  0x4e   : > { %v233_v33 = vadd.f32 %v232_v31, %v231_v29 }
  0x4f   : > { %v242_v34 = vadd.f32 %v241_v32, %v240_v30 }
  0x50   : > { %v244_v35 = vmul.f32 0.03125, %v233_v33 }
  0x51   : > { %v245_v36 = vmul.f32 0.03125, %v242_v34 }
  0x52   : > { %v246_v37 = vsub.f32 %v209_v9, %v244_v35  ;;  %v248_v38 = vsub.f32 %v211_v10, %v244_v35  ;;  %v250_v41 = vsub.f32 %v213_v14, %v244_v35  ;;  %v252_v47 = vsub.f32 %v215_v18, %v244_v35 }
  0x53   : > { %v247_v39 = vsub.f32 %v210_v11, %v245_v36  ;;  %v249_v40 = vsub.f32 %v212_v12, %v245_v36  ;;  %v251_v44 = vsub.f32 %v214_v16, %v245_v36  ;;  %v253_v50 = vsub.f32 %v216_v20, %v245_v36 }
  0x54   : > { %v254_v42 = vmul.f32 %v246_v37, %v246_v37  ;;  %v256_v43 = vmul.f32 %v248_v38, %v248_v38  ;;  %v258_v48 = vmul.f32 %v250_v41, %v250_v41  ;;  %v260_v53 = vmul.f32 %v252_v47, %v252_v47 }
  0x55   : > { %v255_v45 = vmul.f32 %v247_v39, %v247_v39  ;;  %v257_v46 = vmul.f32 %v249_v40, %v249_v40  ;;  %v259_v51 = vmul.f32 %v251_v44, %v251_v44  ;;  %v261_v55 = vmul.f32 %v253_v50, %v253_v50 }
  0x56   : > { %v262_v49 = vadd.f32 %v256_v43, %v254_v42 }
  0x57   : > { %v271_v52 = vadd.f32 %v257_v46, %v255_v45 }
  0x58   : > { %v263_v54 = vadd.f32 %v262_v49, %v258_v48 }
  0x59   : > { %v272_v56 = vadd.f32 %v271_v52, %v259_v51 }
  0x5a   : > { %v264_v57 = vadd.f32 %v263_v54, %v260_v53 }
  0x5b   : > { %v273_v58 = vadd.f32 %v272_v56, %v261_v55 }
  0x5c   : > { %v265_v59 = vrot.slane %v264_v57, 4 }
  0x5d   : > { %v274_v60 = vrot.slane %v273_v58, 4 }
  0x5e   : > { %v266_v61 = vadd.f32 %v265_v59, %v264_v57 }
  0x5f   : > { %v275_v62 = vadd.f32 %v274_v60, %v273_v58 }
  0x60   : > { %v267_v63 = vrot.slane %v266_v61, 2 }
  0x61   : > { %v276_v0 = vrot.slane %v275_v62, 2 }
  0x62   : > { %v268_v1 = vadd.f32 %v267_v63, %v266_v61 }
  0x63   : > { %v277_v2 = vadd.f32 %v276_v0, %v275_v62 }
  0x64   : > { %v269_v3 = vrot.slane %v268_v1, 1 }
  0x65   : > { %v278_v4 = vrot.slane %v277_v2, 1 }
  0x66   : > { %v270_v5 = vadd.f32 %v269_v3, %v268_v1 }
  0x67   : > { %v279_v6 = vadd.f32 %v278_v4, %v277_v2 }
  0x68   : > { %v280_v7 = vmul.f32 0.03125, %v270_v5 }
  0x69   : > { %v281_v8 = vmul.f32 0.03125, %v279_v6 }
  0x6a   : > { %v282_v9 = vadd.f32 1e-06, %v280_v7 }
  0x6b   : > { %v283_v10 = vadd.f32 1e-06, %v281_v8 }
  0x6c   : > { %547 = vrsqrt.f32 %v282_v9 }
  0x6d   : > { %549 = vrsqrt.f32 %v283_v10 }
  0x76   : > { %v548_v11 = vpop.eup %547 }
  0x77   : > { %v550_v12 = vpop.eup %549  ;;  %v286_v15 = vmul.f32 %v548_v11, %v246_v37  ;;  %v288_v17 = vmul.f32 %v548_v11, %v248_v38  ;;  %v290_v21 = vmul.f32 %v548_v11, %v250_v41  ;;  %v292_v23 = vmul.f32 %v548_v11, %v252_v47 }
  0x78   : > { %v287_v16 = vmul.f32 %v550_v12, %v247_v39  ;;  %v289_v18 = vmul.f32 %v550_v12, %v249_v40  ;;  %v291_v22 = vmul.f32 %v550_v12, %v251_v44  ;;  %v293_v24 = vmul.f32 %v550_v12, %v253_v50 }
  0xbb   : > { %v307_v13 = vpop.permute.xlu1 %306  ;;  %v297_v14 = vpop.permute.xlu0 %296 }
  0xbc   : > { %v314_v25 = vmul.f32 %v297_v14, %v286_v15  ;;  %v315_v26 = vmul.f32 %v297_v14, %v287_v16  ;;  %v318_v35 = vmul.f32 %v307_v13, %v290_v21  ;;  %v319_v36 = vmul.f32 %v307_v13, %v291_v22 }
  0xbf   : > { %v312_v19 = vpop.permute.xlu1 %311  ;;  %v302_v20 = vpop.permute.xlu0 %301 }
  0xc0   : > { %v316_v27 = vmul.f32 %v302_v20, %v288_v17  ;;  %v317_v28 = vmul.f32 %v302_v20, %v289_v18  ;;  %v320_v37 = vmul.f32 %v312_v19, %v292_v23  ;;  %v321_v38 = vmul.f32 %v312_v19, %v293_v24 }
  0xc3   : > { %v330_v29 = vpop.permute.xlu1 %329  ;;  %v325_v30 = vpop.permute.xlu0 %324 }
  0xc4   : > { %v344_v31 = vadd.f32 %v330_v29, %v316_v27  ;;  %v345_v32 = vadd.f32 %v330_v29, %v317_v28  ;;  %v342_v33 = vadd.f32 %v325_v30, %v314_v25  ;;  %v343_v34 = vadd.f32 %v325_v30, %v315_v26 }
  0xc6   : > { %352 = vst [vmem:[%s206_s21 + $0x10] sm:$0xff] %v344_v31  ;;  %353 = vst [vmem:[%s206_s21 + $0x18] sm:$0xff] %v345_v32 }
  0xc7   : > { %350 = vst [vmem:[%s206_s21] sm:$0xff] %v342_v33  ;;  %351 = vst [vmem:[%s206_s21 + $0x8] sm:$0xff] %v343_v34  ;;  %v340_v39 = vpop.permute.xlu1 %339  ;;  %v335_v40 = vpop.permute.xlu0 %334 }
  0xc8   : > { %v348_v41 = vadd.f32 %v340_v39, %v320_v37  ;;  %v349_v42 = vadd.f32 %v340_v39, %v321_v38  ;;  %v346_v43 = vadd.f32 %v335_v40, %v318_v35  ;;  %v347_v44 = vadd.f32 %v335_v40, %v319_v36 }
  0xca   : > { %356 = vst [vmem:[%s206_s21 + $0x30] sm:$0xff] %v348_v41  ;;  %357 = vst [vmem:[%s206_s21 + $0x38] sm:$0xff] %v349_v42 }
  0xcb   : > { %354 = vst [vmem:[%s206_s21 + $0x20] sm:$0xff] %v346_v43  ;;  %355 = vst [vmem:[%s206_s21 + $0x28] sm:$0xff] %v347_v44 }
  0xcc   : > { %594 = shalt.err (!%p591_p5)
}
  0xcd   : > { %s595_s4 = scalar_lea.hbm %s856_s15, 1024  ;;  %s599_s19 = scalar_lea.hbm %s908_s3, 2048 }
  0xce   : > { %p596_p4 = scmp.ne.s32.totalorder %s856_s15, %s595_s4  ;;  %p600_p12 = scmp.lt.u32.totalorder %s856_s15, %s908_s3 }
  0xcf   : > { %p601_p1 = scmp.lt.u32.totalorder %s599_s19, %s595_s4  ;;  %p603_p8 = scmp.lt.u32.totalorder %s595_s4, %s856_s15 }
  0xd0   : > { %p597_p7 = pnand %p596_p4, %p916_p9 }
  0xd1   : > { %p602_p3 = por %p601_p1, %p600_p12 }
  0xd2   : > { %p598_p10 = pneg %p597_p7 }
  0xd3   : > { %p604_p11 = por %p603_p8, %p602_p3 }
  0xd5   : > { %p605_p0 = pnand %p604_p11, %p598_p10 }
  0xd7   : > { %608 = shalt.err (!%p605_p0)
}
  0xd8   : > { %s670_s21 = smov 256   ;;  %s671_s10 = smov 16  }
  0xd9   : > { %480 = dma.vmem_to_hbm [thread:$0]  (%p916_p9), %s851_s9, 1024, %s856_s15, %s359_s23, %s670_s21, %s670_s21, %s671_s10  }
  0xda PF: > { %s389_s18 = sand.u32 1, %s643_s12   ;;  %p917_p6 = scmp.ne.s32.totalorder %s913_s27, 0 }
  0xdb   : > { %p918_p13 = scmp.ge.s32.totalorder %s663_s17, 2  ;;  %s390_s22 = scalar_lea.sflag [#allocation4], %s389_s18 }
  0xdd   : > { %p487_p2 = pnand %p918_p13, %p917_p6 }
  0xdf   : > { %638 = dma.done.wait (!%p487_p2), %s390_s22, 1024  }
  0xe0   : > { %640 = vsyncadd (!%p487_p2), %s390_s22, 4294966272  ;;  %s19_s17 = sadd.s32 1, %s663_s17   ;;  %s919_s12 = smov %s647_s13 }
  0xe1   : > { %p16_p5 = scmp.ge.s32.totalorder %s19_s17, 4   ;;  %s920_s13 = smov %s651_s14 }
  0xe2   : > { %s921_s14 = smov %s748_s26  ;;  %s922_s15 = smov %s659_s16 }
  0xe3   : > { %s923_s16 = smov %s925_s20  ;;  %18 = sbr.rel (!%p16_p5) target bundleno = 6 (0x6), region = 77 }
  0xea   :  { %395 = vsyncpa [#allocation3], 1 }
  0xeb   :  { %397 = vsyncpa [#allocation3 + $0x1], 1 }
  0xec   :  { %398 = vsyncpa [#allocation4], 1 }
  0xed   :  { %400 = vsyncpa [#allocation4 + $0x1], 1 }

</bundles_post_ra>
